<compile_context>
chip_gen: v7x
topology: tpu7x:2x2x1
jax: 0.10.0
libtpu: 0.0.40
codegen_flags: <defaults>
</compile_context>

<pallas_src>
import jax
import jax.numpy as jnp
from jax import lax
from jax.experimental import pallas as pl
from jax.experimental.pallas import tpu as pltpu


def _triplet_embed_kernel(x1_ref, x2_ref, x3_ref, w1t_ref, b1_ref,
                          w2p_ref, b2p_ref, o_ref):
    # Assemble the fused (3B, D) activation matrix in VMEM (no HBM copy).
    x = jnp.concatenate([x1_ref[...], x2_ref[...], x3_ref[...]], axis=0)

    # Layer 1: x @ W1, with W1 stored transposed (H, D) for lane-dense loads.
    h = lax.dot_general(
        x, w1t_ref[...],
        dimension_numbers=(((1,), (1,)), ((), ())),
        preferred_element_type=jnp.float32,
    )                                              # (3B, H)
    h = jnp.maximum(h + b1_ref[...], 0.0)          # bias + ReLU, f32 VPU math

    # Layer 2: W2 zero-padded to (H, E_pad) so the output store is lane-dense.
    o = jnp.dot(h, w2p_ref[...], preferred_element_type=jnp.float32)
    o_ref[...] = (o + b2p_ref[...]).astype(o_ref.dtype)   # (3B, E_pad)


def triplet_net_mine_forward(x1, x2, x3, params):
    """Applies the shared embedding net to x1, x2, x3 (NCHW each)."""
    w1, b1, w2, b2 = params
    B = x1.shape[0]
    D = x1.shape[1] * x1.shape[2] * x1.shape[3]
    H = w1.shape[1]
    E = w2.shape[1]
    E_pad = ((E + 127) // 128) * 128

    # Free (layout-preserving) flatten, matches torch .view(B, -1).
    x1f = x1.reshape(B, D).astype(jnp.float32)
    x2f = x2.reshape(B, D).astype(jnp.float32)
    x3f = x3.reshape(B, D).astype(jnp.float32)

    # Lane-dense weight layouts (tiny one-off ops; at scale, store the
    # weights pre-transposed / pre-padded instead of reshuffling per call).
    w1t = w1.T                                     # (H, D): 128-lane dense
    w2p = jnp.pad(w2, ((0, 0), (0, E_pad - E)))    # (H, E_pad)
    b2p = jnp.pad(b2, ((0, 0), (0, E_pad - E)))    # (1, E_pad)
    # TODO(synk): at larger B/D, cast activations/W1 to bf16 for the MXU
    # (keeping preferred_element_type=f32); at this size it is latency-bound.

    vmem = pl.BlockSpec(memory_space=pltpu.MemorySpace.VMEM)
    out = pl.pallas_call(
        _triplet_embed_kernel,
        out_shape=jax.ShapeDtypeStruct((3 * B, E_pad), jnp.float32),
        in_specs=[vmem] * 7,
        out_specs=vmem,
    )(x1f, x2f, x3f, w1t, b1, w2p, b2p)

    emb = out[:, :E]                               # drop lane padding
    return emb[0:B], emb[B:2 * B], emb[2 * B:3 * B]


def init_embedding_params(key, D, H, E):
    k1, k2 = jax.random.split(key)
    # Deterministic, small-scale init (synthetic weights, not a checkpoint).
    w1 = jax.random.normal(k1, (D, H), dtype=jnp.float32) * 0.02
    b1 = jnp.zeros((1, H), dtype=jnp.float32)
    w2 = jax.random.normal(k2, (H, E), dtype=jnp.float32) * 0.02
    b2 = jnp.zeros((1, E), dtype=jnp.float32)
    return (w1, b1, w2, b2)


if __name__ == "__main__":
    key = jax.random.PRNGKey(0)
    kx1, kx2, kx3, kp = jax.random.split(key, 4)

    # B=8 keeps the fused matmul M = 3B = 24 a multiple of 8 (sublane tile).
    B, C, Himg, Wimg = 8, 4, 16, 16
    D = C * Himg * Wimg          # 1024
    Hdim = 32                    # hidden width
    E = 8                        # embedding dim

    x1 = jax.random.normal(kx1, (B, C, Himg, Wimg), dtype=jnp.float32)
    x2 = jax.random.normal(kx2, (B, C, Himg, Wimg), dtype=jnp.float32)
    x3 = jax.random.normal(kx3, (B, C, Himg, Wimg), dtype=jnp.float32)

    params = init_embedding_params(kp, D, Hdim, E)

    fwd = jax.jit(triplet_net_mine_forward)
    o1, o2, o3 = fwd(x1, x2, x3, params)
    jax.block_until_ready((o1, o2, o3))

    # Pure-JAX reference check (same math, outside Pallas).
    w1, b1, w2, b2 = params

    def ref_embed(x):
        h = jnp.maximum(x.reshape(B, D) @ w1 + b1, 0.0)
        return h @ w2 + b2

    r1, r2, r3 = ref_embed(x1), ref_embed(x2), ref_embed(x3)
    assert jnp.allclose(o1, r1, atol=1e-4), "mismatch on output1"
    assert jnp.allclose(o2, r2, atol=1e-4), "mismatch on output2"
    assert jnp.allclose(o3, r3, atol=1e-4), "mismatch on output3"

    print("KERNEL_OK")
</pallas_src>

<mosaic_0001>
module attributes {stable_mosaic.version = 11 : i64} {
  func.func @_triplet_embed_kernel(%arg0: memref<8x1024xf32, #tpu.memory_space<vmem>>, %arg1: memref<8x1024xf32, #tpu.memory_space<vmem>>, %arg2: memref<8x1024xf32, #tpu.memory_space<vmem>>, %arg3: memref<32x1024xf32, #tpu.memory_space<vmem>>, %arg4: memref<1x32xf32, #tpu.memory_space<vmem>>, %arg5: memref<32x128xf32, #tpu.memory_space<vmem>>, %arg6: memref<1x128xf32, #tpu.memory_space<vmem>>, %arg7: memref<24x128xf32, #tpu.memory_space<vmem>>) attributes {dimension_semantics = [], scalar_prefetch = 0 : i64, scratch_operands = 0 : i64, tpu.core_type = #tpu.core_type<tc>} {
    %c0 = arith.constant 0 : index
    %c0_0 = arith.constant 0 : index
    %0 = vector.load %arg0[%c0, %c0_0] : memref<8x1024xf32, #tpu.memory_space<vmem>>, vector<8x1024xf32>
    %c0_1 = arith.constant 0 : index
    %c0_2 = arith.constant 0 : index
    %1 = vector.load %arg1[%c0_1, %c0_2] : memref<8x1024xf32, #tpu.memory_space<vmem>>, vector<8x1024xf32>
    %c0_3 = arith.constant 0 : index
    %c0_4 = arith.constant 0 : index
    %2 = vector.load %arg2[%c0_3, %c0_4] : memref<8x1024xf32, #tpu.memory_space<vmem>>, vector<8x1024xf32>
    %3 = tpu.concatenate %0, %1, %2 in 0 : vector<8x1024xf32>, vector<8x1024xf32>, vector<8x1024xf32> -> vector<24x1024xf32>
    %c0_5 = arith.constant 0 : index
    %c0_6 = arith.constant 0 : index
    %4 = vector.load %arg3[%c0_5, %c0_6] : memref<32x1024xf32, #tpu.memory_space<vmem>>, vector<32x1024xf32>
    %cst = arith.constant dense<0.000000e+00> : vector<24x32xf32>
    %5 = tpu.matmul %3, %4, %cst {dimension_numbers = #tpu.dot_dimension_numbers<[1], [1], [0], [0], [0, 0, 1, 0], [], []>} : vector<24x1024xf32>, vector<32x1024xf32>, vector<24x32xf32> -> vector<24x32xf32>
    %c0_7 = arith.constant 0 : index
    %c0_8 = arith.constant 0 : index
    %6 = vector.load %arg4[%c0_7, %c0_8] : memref<1x32xf32, #tpu.memory_space<vmem>>, vector<1x32xf32>
    %7 = vector.broadcast %6 : vector<1x32xf32> to vector<24x32xf32>
    %8 = arith.addf %5, %7 : vector<24x32xf32>
    %cst_9 = arith.constant 0.000000e+00 : f32
    %9 = vector.broadcast %cst_9 : f32 to vector<24x32xf32>
    %10 = arith.maximumf %8, %9 : vector<24x32xf32>
    %c0_10 = arith.constant 0 : index
    %c0_11 = arith.constant 0 : index
    %11 = vector.load %arg5[%c0_10, %c0_11] : memref<32x128xf32, #tpu.memory_space<vmem>>, vector<32x128xf32>
    %cst_12 = arith.constant dense<0.000000e+00> : vector<24x128xf32>
    %12 = tpu.matmul %10, %11, %cst_12 {dimension_numbers = #tpu.dot_dimension_numbers<[1], [0], [0], [1], [0, 0, 1, 1], [], []>} : vector<24x32xf32>, vector<32x128xf32>, vector<24x128xf32> -> vector<24x128xf32>
    %c0_13 = arith.constant 0 : index
    %c0_14 = arith.constant 0 : index
    %13 = vector.load %arg6[%c0_13, %c0_14] : memref<1x128xf32, #tpu.memory_space<vmem>>, vector<1x128xf32>
    %14 = vector.broadcast %13 : vector<1x128xf32> to vector<24x128xf32>
    %15 = arith.addf %12, %14 : vector<24x128xf32>
    %c0_15 = arith.constant 0 : index
    %c0_16 = arith.constant 0 : index
    %16 = vector.load %arg7[%c0_15, %c0_16] : memref<24x128xf32, #tpu.memory_space<vmem>>, vector<24x128xf32>
    tpu.vector_store %arg7[%c0_15, %c0_16], %15 {strides = array<i32>} : memref<24x128xf32, #tpu.memory_space<vmem>>, vector<24x128xf32>,
    return
  }
}

</mosaic_0001>

<bundles_post_ra>
// kernel: triplet_net_mine_forward.1
= control target key start
LH: loop header
LB: loop body
LE: loop exit
PB: predicated region body
PF: predicated region fallthrough
CT: control target
= control target key end

     0   :  { %vm611_vm0 = vmmov 0   ;;  %vm423_vm1 = vcmask 261120   ;;  %s851_s3 = inlined_call_operand.vmem [shape: f32[32,1024], index: 3, kind: input, shape index: {}]   ;;  %s852_s0 = inlined_call_operand.vmem [shape: f32[8,1024], index: 0, kind: input, shape index: {}]   ;;  %s853_s1 = inlined_call_operand.vmem [shape: f32[8,1024], index: 1, kind: input, shape index: {}]   ;;  %s854_s2 = inlined_call_operand.vmem [shape: f32[8,1024], index: 2, kind: input, shape index: {}]   ;;  %s855_s5 = inlined_call_operand.vmem [shape: f32[32,128], index: 5, kind: input, shape index: {}]   ;;  %s856_s4 = inlined_call_operand.vmem [shape: f32[1,32], index: 4, kind: input, shape index: {}]   ;;  %s857_s6 = inlined_call_operand.vmem [shape: f32[1,128], index: 6, kind: input, shape index: {}]   ;;  %s858_s7 = inlined_call_operand.vmem [shape: f32[24,128], index: 7, kind: output, shape index: {}]  }
   0x1   :  { %v53_v0 = vld [vmem:[%s851_s3 + $0x18] sm:$0xff]  ;;  %v52_v2 = vld [vmem:[%s851_s3 + $0x10] sm:$0xff]  ;;  %v51_v5 = vld [vmem:[%s851_s3 + $0x8] sm:$0xff] }
   0x2   :  { %v61_v1 = vld [vmem:[%s851_s3 + $0x58] sm:$0xff]  ;;  %v60_v4 = vld [vmem:[%s851_s3 + $0x50] sm:$0xff]  ;;  %v59_v6 = vld [vmem:[%s851_s3 + $0x48] sm:$0xff] }
   0x3   :  { %v557_v3 = vpack.c.bf16 %v61_v1, %v53_v0  ;;  %v559_v7 = vpack.c.bf16 %v60_v4, %v52_v2  ;;  %v549_v8 = vpack.c.bf16 %v59_v6, %v51_v5  ;;  %v50_v9 = vld [vmem:[%s851_s3] sm:$0xff]  ;;  %v69_v11 = vld [vmem:[%s851_s3 + $0x98] sm:$0xff]  ;;  %v68_v15 = vld [vmem:[%s851_s3 + $0x90] sm:$0xff] }
   0x4   :  { %v58_v10 = vld [vmem:[%s851_s3 + $0x40] sm:$0xff]  ;;  %v77_v13 = vld [vmem:[%s851_s3 + $0xd8] sm:$0xff]  ;;  %v67_v16 = vld [vmem:[%s851_s3 + $0x88] sm:$0xff] }
   0x5   :  { %558 = vmatprep.subr.bf16.mxu0 %v557_v3  ;;  %v551_v12 = vpack.c.bf16 %v58_v10, %v50_v9  ;;  %550 = vmatprep.subr.bf16.mxu1 %v549_v8  ;;  %v561_v14 = vpack.c.bf16 %v77_v13, %v69_v11  ;;  %v75_v17 = vld [vmem:[%s851_s3 + $0xc8] sm:$0xff]  ;;  %v76_v18 = vld [vmem:[%s851_s3 + $0xd0] sm:$0xff]  ;;  %v66_v20 = vld [vmem:[%s851_s3 + $0x80] sm:$0xff]  ;;  %v610_v11 = vmov 0.0|0.0  }
   0x6   :  { %560 = vmatpush1.bf16.xpose.msra.mxu0 %v559_v7  ;;  %v553_v19 = vpack.c.bf16 %v75_v17, %v67_v16  ;;  %v29_v21 = vld [vmem:[%s852_s0 + $0x18] sm:$0xff]  ;;  %v74_v22 = vld [vmem:[%s851_s3 + $0xc0] sm:$0xff]  ;;  %v55_v23 = vld [vmem:[%s851_s3 + $0x28] sm:$0xff]  ;;  %v563_v27 = vpack.c.bf16 %v76_v18, %v68_v15  ;;  %v612_v15 = vmov 0.0  }
   0x7   :  { %552 = vmatpush1.bf16.xpose.msra.mxu1 %v551_v12  ;;  %562 = vmatprep.subr.bf16.mxu0 %v561_v14  ;;  %v63_v24 = vld [vmem:[%s851_s3 + $0x68] sm:$0xff]  ;;  %v57_v26 = vld [vmem:[%s851_s3 + $0x38] sm:$0xff]  ;;  %v555_v29 = vpack.c.bf16 %v74_v22, %v66_v20  ;;  %v54_v32 = vld [vmem:[%s851_s3 + $0x20] sm:$0xff] }
   0x8   :  { %233 = vmatprep.mubr.f32.mxu0 %v29_v21  ;;  %554 = vmatprep.subr.bf16.mxu1 %v553_v19  ;;  %v27_v25 = vld [vmem:[%s852_s0 + $0x8] sm:$0xff]  ;;  %v65_v28 = vld [vmem:[%s851_s3 + $0x78] sm:$0xff]  ;;  %v565_v30 = vpack.c.bf16 %v63_v24, %v55_v23  ;;  %v62_v33 = vld [vmem:[%s851_s3 + $0x60] sm:$0xff] }
   0x9   :  { %153 = vmatprep.mubr.f32.mxu1 %v27_v25  ;;  %v573_v31 = vpack.c.bf16 %v65_v28, %v57_v26  ;;  %v56_v34 = vld [vmem:[%s851_s3 + $0x30] sm:$0xff]  ;;  %v71_v36 = vld [vmem:[%s851_s3 + $0xa8] sm:$0xff]  ;;  %v567_v39 = vpack.c.bf16 %v62_v33, %v54_v32  ;;  %v73_v40 = vld [vmem:[%s851_s3 + $0xb8] sm:$0xff] }
   0xa   :  { %v64_v35 = vld [vmem:[%s851_s3 + $0x70] sm:$0xff]  ;;  %v79_v37 = vld [vmem:[%s851_s3 + $0xe8] sm:$0xff]  ;;  %v81_v41 = vld [vmem:[%s851_s3 + $0xf8] sm:$0xff] }
   0xb   :  { %v28_v38 = vld [vmem:[%s852_s0 + $0x10] sm:$0xff]  ;;  %v26_v42 = vld [vmem:[%s852_s0] sm:$0xff]  ;;  %v575_v43 = vpack.c.bf16 %v64_v35, %v56_v34  ;;  %v37_v44 = vld [vmem:[%s853_s1 + $0x18] sm:$0xff]  ;;  %v569_v45 = vpack.c.bf16 %v79_v37, %v71_v36  ;;  %v577_v47 = vpack.c.bf16 %v81_v41, %v73_v40 }
   0xc   :  { %v35_v46 = vld [vmem:[%s853_s1 + $0x8] sm:$0xff]  ;;  %v36_v48 = vld [vmem:[%s853_s1 + $0x10] sm:$0xff]  ;;  %v70_v49 = vld [vmem:[%s851_s3 + $0xa0] sm:$0xff] }
   0xd   :  { %v78_v50 = vld [vmem:[%s851_s3 + $0xe0] sm:$0xff]  ;;  %v45_v51 = vld [vmem:[%s854_s2 + $0x18] sm:$0xff]  ;;  %v72_v53 = vld [vmem:[%s851_s3 + $0xb0] sm:$0xff] }
   0xe   :  { %564 = vmatpush1.bf16.xpose.msra.mxu0 %v563_v27  ;;  %v34_v52 = vld [vmem:[%s853_s1] sm:$0xff]  ;;  %v80_v54 = vld [vmem:[%s851_s3 + $0xf0] sm:$0xff]  ;;  %v43_v55 = vld [vmem:[%s854_s2 + $0x8] sm:$0xff]  ;;  %v571_v56 = vpack.c.bf16 %v78_v50, %v70_v49 }
   0xf   :  { %556 = vmatpush1.bf16.xpose.msra.mxu1 %v555_v29  ;;  %566 = vmatprep.subr.bf16.mxu0 %v565_v30  ;;  %v44_v57 = vld [vmem:[%s854_s2 + $0x10] sm:$0xff]  ;;  %v31_v58 = vld [vmem:[%s852_s0 + $0x28] sm:$0xff]  ;;  %v579_v59 = vpack.c.bf16 %v80_v54, %v72_v53  ;;  %v42_v60 = vld [vmem:[%s854_s2] sm:$0xff] }
  0x10   :  { %587 = vmatprep.subr.bf16.mxu1 %v573_v31  ;;  %v41_v61 = vld [vmem:[%s853_s1 + $0x38] sm:$0xff]  ;;  %v30_v62 = vld [vmem:[%s852_s0 + $0x20] sm:$0xff]  ;;  %v39_v63 = vld [vmem:[%s853_s1 + $0x28] sm:$0xff] }
  0x11   :  { %v40_v0 = vld [vmem:[%s853_s1 + $0x30] sm:$0xff]  ;;  %v49_v1 = vld [vmem:[%s854_s2 + $0x38] sm:$0xff]  ;;  %v38_v2 = vld [vmem:[%s853_s1 + $0x20] sm:$0xff] }
  0x12   :  { %v47_v3 = vld [vmem:[%s854_s2 + $0x28] sm:$0xff]  ;;  %v48_v4 = vld [vmem:[%s854_s2 + $0x30] sm:$0xff]  ;;  %v46_v5 = vld [vmem:[%s854_s2 + $0x20] sm:$0xff] }
  0x13   :  { %v33_v6 = vld [vmem:[%s852_s0 + $0x38] sm:$0xff]  ;;  %v32_v7 = vld [vmem:[%s852_s0 + $0x30] sm:$0xff]  ;;  %v412_v8 = vld [vmem:[%s855_s5] sm:$0xff] }
  0x14   :  { %v413_v9 = vld [vmem:[%s855_s5 + $0x8] sm:$0xff]  ;;  %v414_v12 = vld [vmem:[%s855_s5 + $0x10] sm:$0xff]  ;;  %v415_v13 = vld [vmem:[%s855_s5 + $0x18] sm:$0xff] }
  0x15   :  { %234 = vmatmul.mubr.f32.vlgmr.msra.gmra.mrb[0].mxu0 %v28_v38  ;;  %v582_v10 = vpack.c.bf16 %v413_v9, %v412_v8  ;;  %v585_v14 = vpack.c.bf16 %v415_v13, %v414_v12  ;;  %v520_v22 = vld [vmem:[%s856_s4] ss:$0 sm:$0xff] }
  0x16   :  { %568 = vmatpush1.bf16.xpose.msra.mxu0 %v567_v39  ;;  %154 = vmatmul.mubr.f32.vlgmr.msra.gmra.mrb[0].mxu1 %v26_v42 }
  0x17   :  { %238 = vmatprep.mubr.f32.mxu0 %v37_v44  ;;  %589 = vmatpush1.bf16.xpose.msra.mxu1 %v575_v43  ;;  %v521_v44 = vld [vmem:[%s857_s6] ss:$0 sm:$0xff] }
  0x18   :  { %570 = vmatprep.subr.bf16.mxu0 %v569_v45  ;;  %158 = vmatprep.mubr.f32.mxu1 %v35_v46 }
  0x19   :  { %239 = vmatmul.mubr.f32.gmra.mrb[2].mxu0 %v36_v48  ;;  %588 = vmatprep.subr.bf16.mxu1 %v577_v47 }
  0x1a   :  { %243 = vmatprep.mubr.f32.mxu0 %v45_v51  ;;  %159 = vmatmul.mubr.f32.gmra.mrb[2].mxu1 %v34_v52 }
  0x1b   :  { %163 = vmatprep.mubr.f32.mxu1 %v43_v55 }
  0x1d   :  { %244 = vmatmul.mubr.f32.gmra.mrb[4].mxu0 %v44_v57 }
  0x1e   :  { %572 = vmatpush1.bf16.xpose.msra.mxu0 %v571_v56  ;;  %313 = vmatprep.mubr.f32.mxu0 %v31_v58 }
  0x1f   :  { %590 = vmatpush1.bf16.xpose.msra.mxu1 %v579_v59  ;;  %574 = vmatprep.subr.bf16.mxu0 %v573_v31 }
  0x20   :  { %164 = vmatmul.mubr.f32.gmra.mrb[4].mxu1 %v42_v60  ;;  %581 = vmatprep.subr.bf16.mxu1 %v610_v11 }
  0x21   :  { %398 = vmatprep.mubr.f32.mxu1 %v41_v61 }
  0x25   :  { %314 = vmatmul.mubr.f32.vlgmr.msra.gmra.mrb[0].mxu0 %v30_v62 }
  0x26   :  { %576 = vmatpush1.bf16.xpose.msra.mxu0 %v575_v43  ;;  %318 = vmatprep.mubr.f32.mxu0 %v39_v63 }
  0x27   :  { %399 = vmatmul.mubr.f32.vlgmr.msra.gmra.mrb[6].mxu1 %v40_v0  ;;  %578 = vmatprep.subr.bf16.mxu0 %v577_v47 }
  0x28   :  { %403 = vmatprep.mubr.f32.mxu1 %v49_v1  ;;  %583 = vmatpush3.bf16.msra.mxu1 %v582_v10 }
  0x29   :  { %319 = vmatmul.mubr.f32.gmra.mrb[2].mxu0 %v38_v2  ;;  %584 = vmatprep.subr.bf16.mxu1 %v610_v11 }
  0x2a   :  { %323 = vmatprep.mubr.f32.mxu0 %v47_v3 }
  0x2b   :  { %404 = vmatmul.mubr.f32.gmra.mrb[8].mxu1 %v48_v4 }
  0x2c   :  { %586 = vmatpush3.bf16.msra.mxu1 %v585_v14  ;;  %540 = vmatprep.mubr.msk.f32.mxu1 %vm611_vm0, %v612_v15 }
  0x2d   :  { %324 = vmatmul.mubr.f32.gmra.mrb[4].mxu0 %v46_v5 }
  0x2e   :  { %580 = vmatpush1.bf16.xpose.msra.mxu0 %v579_v59  ;;  %393 = vmatprep.mubr.f32.mxu0 %v33_v6 }
  0x35   :  { %394 = vmatmul.mubr.f32.vlgmr.msra.gmra.mrb[0].mxu0 %v32_v7 }
  0xe9   :  { %v155_v16 = vpop.f32.mrb[0].mxu1 }
  0xea   :  { %v157_v17 = vpop.f32.mrb[1].mxu1  ;;  %v156_v37 = vadd.f32 %v520_v22, %v155_v16 }
  0xed   :  { %v160_v18 = vpop.f32.mrb[2].mxu1 }
  0xee   :  { %v162_v19 = vpop.f32.mrb[3].mxu1  ;;  %v161_v23 = vadd.f32 %v520_v22, %v160_v18 }
  0xf3   :  { %v165_v20 = vpop.f32.mrb[4].mxu1 }
  0xf4   :  { %v167_v21 = vpop.f32.mrb[5].mxu1  ;;  %v166_v27 = vadd.f32 %v520_v22, %v165_v20 }
  0xfa   :  { %v400_v24 = vpop.f32.mrb[6].mxu1 }
  0xfb   :  { %v402_v25 = vpop.f32.mrb[7].mxu1 }
  0xfc   :  { %v320_v26 = vpop.f32.mrb[2].mxu0 }
  0xfd   :  { %v594_v28 = vadd.f32 %v320_v26, %v161_v23  ;;  %v322_v29 = vpop.f32.mrb[3].mxu0 }
  0xfe   :  { %v405_v30 = vpop.f32.mrb[8].mxu1 }
  0xff   :  { %v595_v31 = vadd.f32 %v594_v28, %v400_v24  ;;  %v407_v32 = vpop.f32.mrb[9].mxu1 }
 0x100   :  { %v325_v33 = vpop.f32.mrb[4].mxu0 }
 0x101   :  { %v597_v34 = vadd.f32 %v325_v33, %v166_v27  ;;  %v327_v35 = vpop.f32.mrb[5].mxu0  ;;  %v410_v42 = vmax.f32 %v595_v31, 0.0 }
 0x103   :  { %v598_v36 = vadd.f32 %v597_v34, %v405_v30 }
 0x105   :  { %v411_v43 = vmax.f32 %v598_v36, 0.0 }
 0x108   :  { %v395_v38 = vpop.f32.mrb[0].mxu0 }
 0x109   :  { %v592_v39 = vadd.f32 %v395_v38, %v156_v37  ;;  %v397_v40 = vpop.f32.mrb[1].mxu0 }
 0x10b   :  { %v409_v41 = vmax.f32 %v592_v39, 0.0 }
 0x10d   :  { %541 = vmatmul.mubr.msk.f32.vlgmr.msra.gmra.mrb[10].mxu1 %vm423_vm1, %v409_v41 }
 0x10e   :  { %543 = vmatprep.mubr.msk.f32.mxu1 %vm611_vm0, %v612_v15 }
 0x111   :  { %544 = vmatmul.mubr.msk.f32.gmra.mrb[12].mxu1 %vm423_vm1, %v410_v42 }
 0x112   :  { %546 = vmatprep.mubr.msk.f32.mxu1 %vm611_vm0, %v612_v15 }
 0x115   :  { %547 = vmatmul.mubr.msk.f32.gmra.mrb[14].mxu1 %vm423_vm1, %v411_v43 }
 0x1e0   :  { %v499_v45 = vpop.f32.mrb[10].mxu1 }
 0x1e1   :  { %v500_v46 = vadd.f32 %v521_v44, %v499_v45  ;;  %v542_v47 = vpop.f32.mrb[11].mxu1 }
 0x1e3   :  { %513 = vst [vmem:[%s858_s7] sm:$0xff] %v500_v46 }
 0x1e4   :  { %v504_v48 = vpop.f32.mrb[12].mxu1 }
 0x1e5   :  { %v505_v49 = vadd.f32 %v521_v44, %v504_v48  ;;  %v545_v50 = vpop.f32.mrb[13].mxu1 }
 0x1e7   :  { %514 = vst [vmem:[%s858_s7 + $0x8] sm:$0xff] %v505_v49 }
 0x1e8   :  { %v509_v51 = vpop.f32.mrb[14].mxu1 }
 0x1e9   :  { %v510_v52 = vadd.f32 %v521_v44, %v509_v51  ;;  %v548_v53 = vpop.f32.mrb[15].mxu1 }
 0x1eb   :  { %515 = vst [vmem:[%s858_s7 + $0x10] sm:$0xff] %v510_v52 }

</bundles_post_ra>
